<compile_context>
chip_gen: v7x
topology: tpu7x:2x2x1
jax: 0.10.0
libtpu: 0.0.40
codegen_flags: <defaults>
</compile_context>

<pallas_src>
import functools

import jax
import jax.numpy as jnp
from jax.experimental import pallas as pl
from jax.experimental.pallas import tpu as pltpu


class BaseMetric:
    """JAX mirror of the abstract PyTorch BaseMetric."""

    def __call__(self, pred, target):
        return self.forward(pred, target)

    def forward(self, pred, target):
        raise NotImplementedError()


# ----------------------------- Pallas kernel --------------------------------

_LANES = 128
_SUBLANES = 8
# 8192 x 128 x 4 B = 4 MiB per input block: 2 inputs x 2 pipeline buffers
# = 16 MiB + 128 KiB accumulator. Good for v6e/v7x roofline; requires raising
# the scoped-VMEM limit above v5e's 16 MiB default (done below).
_MAX_TILE_ROWS = 8192
_ACC_ROWS = 256                 # fixed 256 x 128 f32 accumulator = 128 KiB
_VMEM_LIMIT_BYTES = 40 << 20    # explicit: > v5e 16 MiB default, < v7x 64 MiB physical
_NUM_CORES = 2                  # megacore split (harmless on 1-TC chips)


def _round_up(x, m):
    return ((x + m - 1) // m) * m


def _sse_kernel(pred_ref, target_ref, out_ref, acc_ref, *,
                tile_rows, acc_rows, total_rows, blocks_per_core, needs_mask):
    """Accumulate sum of squared error over row blocks of a [rows, 128] slab.

    Grid is (num_cores, blocks_per_core): axis 0 is megacore-parallel, axis 1
    is the sequential reduction. acc_ref is a small (acc_rows, 128) f32 VMEM
    accumulator per core; the cross-lane reduce + SMEM scalar write happen
    once per core on the last step.
    """
    i = pl.program_id(1)

    @pl.when(i == 0)
    def _():
        acc_ref[...] = jnp.zeros_like(acc_ref)

    d = pred_ref[...].astype(jnp.float32) - target_ref[...].astype(jnp.float32)
    sq = d * d

    if needs_mask:
        # Mask rows past the end of the array (partial last block and any
        # padded grid step whose index_map was clamped). Uses the *unclamped*
        # block index so fully-padded steps contribute exactly zero.
        block_idx = pl.program_id(0) * blocks_per_core + i
        row0 = block_idx * tile_rows
        row_ids = row0 + jax.lax.broadcasted_iota(
            jnp.int32, (tile_rows, _LANES), 0)
        sq = jnp.where(row_ids < total_rows, sq, 0.0)

    # Fold the (tile_rows, 128) block into the small (acc_rows, 128)
    # accumulator: sublane-split reshape (free) + VALU adds.
    acc_ref[...] += sq.reshape(-1, acc_rows, _LANES).sum(axis=0)

    @pl.when(i == pl.num_programs(1) - 1)
    def _():
        out_ref[0, 0] = jnp.sum(acc_ref[...])


def _sse_pallas(pred2d, target2d, *, max_tile_rows=_MAX_TILE_ROWS):
    """Sum of squared error over a [rows, 128] lane-dense slab."""
    rows, lanes = pred2d.shape
    assert lanes == _LANES
    itemsize = jnp.dtype(pred2d.dtype).itemsize
    # Packed dtypes (bf16/int8) need a larger sublane multiple: (8,128) f32,
    # (16,128) 16-bit, (32,128) 8-bit.
    sublane_mult = max(_SUBLANES, 32 // max(itemsize, 1))

    tile_rows = min(max_tile_rows, _round_up(rows, sublane_mult))
    acc_rows = min(_ACC_ROWS, tile_rows)
    tile_rows = _round_up(tile_rows, acc_rows)  # fold-reshape divisibility

    num_blocks = pl.cdiv(rows, tile_rows)
    num_cores = _NUM_CORES if num_blocks >= _NUM_CORES else 1
    blocks_per_core = pl.cdiv(num_blocks, num_cores)

    # Only pay the mask (iota + compare + select) when the shape requires it.
    needs_mask = (rows % tile_rows != 0) or (
        num_cores * blocks_per_core != num_blocks)

    kernel = functools.partial(
        _sse_kernel,
        tile_rows=tile_rows,
        acc_rows=acc_rows,
        total_rows=rows,
        blocks_per_core=blocks_per_core,
        needs_mask=needs_mask,
    )

    def in_map(c, i):
        # Clamp padded grid steps onto the last valid block; the kernel masks
        # their contribution to zero.
        return (jnp.minimum(c * blocks_per_core + i, num_blocks - 1), 0)

    n_elems = rows * lanes
    partials = pl.pallas_call(
        kernel,
        out_shape=jax.ShapeDtypeStruct((num_cores, 1), jnp.float32),
        grid_spec=pltpu.PrefetchScalarGridSpec(
            num_scalar_prefetch=0,
            grid=(num_cores, blocks_per_core),
            in_specs=[
                pl.BlockSpec((tile_rows, _LANES), in_map),
                pl.BlockSpec((tile_rows, _LANES), in_map),
            ],
            out_specs=pl.BlockSpec(
                (1, 1), lambda c, i: (c, 0), memory_space=pltpu.SMEM
            ),
            scratch_shapes=[pltpu.VMEM((acc_rows, _LANES), jnp.float32)],
        ),
        compiler_params=pltpu.CompilerParams(
            dimension_semantics=("parallel", "arbitrary"),
            vmem_limit_bytes=_VMEM_LIMIT_BYTES,
        ),
        cost_estimate=pl.CostEstimate(
            flops=3 * n_elems,
            transcendentals=0,
            bytes_accessed=2 * n_elems * itemsize + 4 * num_cores,
        ),
    )(pred2d, target2d)
    return jnp.sum(partials)


class MSEMetric(BaseMetric):
    """Concrete metric: mean squared error, reduction done in a Pallas kernel."""

    def forward(self, pred, target):
        assert pred.shape == target.shape
        n = pred.size
        p = pred.reshape(-1)
        t = target.reshape(-1)

        rows = n // _LANES
        sse = jnp.float32(0.0)
        n_kernel = 0
        if rows >= _SUBLANES:
            # Lane-dense bulk: contiguous reshape to (rows, 128), no pad copy.
            n_kernel = rows * _LANES
            p2 = p[:n_kernel].reshape(rows, _LANES)
            t2 = t[:n_kernel].reshape(rows, _LANES)
            sse = sse + _sse_pallas(p2, t2)
        if n_kernel < n:
            # Tiny remainder (< 128 elems, or whole array when rows < 8).
            dr = p[n_kernel:].astype(jnp.float32) - t[n_kernel:].astype(
                jnp.float32)
            sse = sse + jnp.sum(dr * dr)

        return sse / n


# --------------------------------- main --------------------------------------

if __name__ == "__main__":
    key = jax.random.PRNGKey(0)
    k1, k2 = jax.random.split(key)
    # NCHW metric inputs, small shapes.
    pred = jax.random.normal(k1, (2, 4, 16, 16), dtype=jnp.float32)
    target = jax.random.normal(k2, (2, 4, 16, 16), dtype=jnp.float32)

    # Abstract base behaves exactly like PyTorch: forward raises.
    base = BaseMetric()
    try:
        base(pred, target)
        raise AssertionError("BaseMetric.forward should raise NotImplementedError")
    except NotImplementedError:
        pass

    metric = MSEMetric()
    out = jax.block_until_ready(metric(pred, target))
    ref = jnp.mean((pred - target) ** 2)
    assert jnp.allclose(out, ref, rtol=1e-5, atol=1e-5), (out, ref)

    # Shape with a sub-128 lane tail and a partial (masked) last row block.
    k3, k4 = jax.random.split(k1)
    pred2 = jax.random.normal(k3, (3, 5, 7, 11), dtype=jnp.float32)
    target2 = jax.random.normal(k4, (3, 5, 7, 11), dtype=jnp.float32)
    out2 = jax.block_until_ready(metric(pred2, target2))
    ref2 = jnp.mean((pred2 - target2) ** 2)
    assert jnp.allclose(out2, ref2, rtol=1e-5, atol=1e-5), (out2, ref2)

    # Exercise the multi-block, two-core grid path with a forced small tile:
    # rows = 256, tile_rows = 64 -> grid (2, 2), even split, no mask.
    k5, k6 = jax.random.split(k2)
    a = jax.random.normal(k5, (256, 128), dtype=jnp.float32)
    b = jax.random.normal(k6, (256, 128), dtype=jnp.float32)
    sse = jax.block_until_ready(_sse_pallas(a, b, max_tile_rows=64))
    ref_sse = jnp.sum((a - b) ** 2)
    assert jnp.allclose(sse, ref_sse, rtol=1e-5, atol=1e-4), (sse, ref_sse)

    # Odd block count + partial last block: rows = 300, tile 64 -> 5 blocks,
    # padded to (2 cores x 3 steps) with a clamped+masked padding step.
    k7, k8 = jax.random.split(k5)
    a2 = jax.random.normal(k7, (300, 128), dtype=jnp.float32)
    b2 = jax.random.normal(k8, (300, 128), dtype=jnp.float32)
    sse2 = jax.block_until_ready(_sse_pallas(a2, b2, max_tile_rows=64))
    ref_sse2 = jnp.sum((a2 - b2) ** 2)
    assert jnp.allclose(sse2, ref_sse2, rtol=1e-5, atol=1e-4), (sse2, ref_sse2)

    print("KERNEL_OK")
</pallas_src>

<mosaic_0001>
module attributes {stable_mosaic.version = 11 : i64} {
  func.func @_sse_kernel(%arg0: i32, %arg1: i32, %arg2: memref<16x128xf32, #tpu.memory_space<vmem>>, %arg3: memref<16x128xf32, #tpu.memory_space<vmem>>, %arg4: memref<1x1xf32, #tpu.memory_space<smem>>, %arg5: memref<16x128xf32, #tpu.memory_space<vmem>>) attributes {dimension_semantics = [#tpu.dimension_semantics<parallel>, #tpu.dimension_semantics<arbitrary>], iteration_bounds = array<i64: 1, 1>, scalar_prefetch = 0 : i64, scratch_operands = 1 : i64, tpu.core_type = #tpu.core_type<tc>, window_params = [{transform_indices = @transform_0, window_bounds = array<i64: 16, 128>}, {transform_indices = @transform_1, window_bounds = array<i64: 16, 128>}, {transform_indices = @transform_2, window_bounds = array<i64: 1, 1>}]} {
    %c0_i32 = arith.constant 0 : i32
    %0 = arith.cmpi eq, %arg1, %c0_i32 : i32
    %1 = arith.extui %0 : i1 to i32
    %c0_i32_0 = arith.constant 0 : i32
    %2 = arith.cmpi ne, %1, %c0_i32_0 : i32
    scf.if %2 {
      %cst_10 = arith.constant 0.000000e+00 : f32
      %15 = vector.broadcast %cst_10 : f32 to vector<16x128xf32>
      %c0_11 = arith.constant 0 : index
      %c0_12 = arith.constant 0 : index
      %16 = vector.load %arg5[%c0_11, %c0_12] : memref<16x128xf32, #tpu.memory_space<vmem>>, vector<16x128xf32>
      tpu.vector_store %arg5[%c0_11, %c0_12], %15 {strides = array<i32>} : memref<16x128xf32, #tpu.memory_space<vmem>>, vector<16x128xf32>,
    } else {
    }
    %c0 = arith.constant 0 : index
    %c0_1 = arith.constant 0 : index
    %3 = vector.load %arg2[%c0, %c0_1] : memref<16x128xf32, #tpu.memory_space<vmem>>, vector<16x128xf32>
    %c0_2 = arith.constant 0 : index
    %c0_3 = arith.constant 0 : index
    %4 = vector.load %arg3[%c0_2, %c0_3] : memref<16x128xf32, #tpu.memory_space<vmem>>, vector<16x128xf32>
    %5 = arith.subf %3, %4 : vector<16x128xf32>
    %6 = arith.mulf %5, %5 : vector<16x128xf32>
    %c0_4 = arith.constant 0 : index
    %c0_5 = arith.constant 0 : index
    %7 = vector.load %arg5[%c0_4, %c0_5] : memref<16x128xf32, #tpu.memory_space<vmem>>, vector<16x128xf32>
    %8 = vector.shape_cast %6 : vector<16x128xf32> to vector<1x16x128xf32>
    %cst = arith.constant dense<0.000000e+00> : vector<16x128xf32>
    %9 = vector.multi_reduction <add>, %8, %cst [0] : vector<1x16x128xf32> to vector<16x128xf32>
    %10 = arith.addf %7, %9 : vector<16x128xf32>
    %c0_6 = arith.constant 0 : index
    %c0_7 = arith.constant 0 : index
    %11 = vector.load %arg5[%c0_6, %c0_7] : memref<16x128xf32, #tpu.memory_space<vmem>>, vector<16x128xf32>
    tpu.vector_store %arg5[%c0_6, %c0_7], %10 {strides = array<i32>} : memref<16x128xf32, #tpu.memory_space<vmem>>, vector<16x128xf32>,
    %c0_i32_8 = arith.constant 0 : i32
    %12 = arith.cmpi eq, %arg1, %c0_i32_8 : i32
    %13 = arith.extui %12 : i1 to i32
    %c0_i32_9 = arith.constant 0 : i32
    %14 = arith.cmpi ne, %13, %c0_i32_9 : i32
    scf.if %14 {
      %c0_10 = arith.constant 0 : index
      %c0_11 = arith.constant 0 : index
      %15 = vector.load %arg5[%c0_10, %c0_11] : memref<16x128xf32, #tpu.memory_space<vmem>>, vector<16x128xf32>
      %16 = vector.shape_cast %15 : vector<16x128xf32> to vector<1x16x128xf32>
      %cst_12 = arith.constant dense<0.000000e+00> : vector<1xf32>
      %17 = vector.multi_reduction <add>, %16, %cst_12 [1, 2] : vector<1x16x128xf32> to vector<1xf32>
      %18 = vector.shape_cast %17 : vector<1xf32> to vector<1x1x1xf32>
      %19 = vector.extract %18[0, 0, 0] : f32 from vector<1x1x1xf32>
      %c0_13 = arith.constant 0 : index
      %c0_14 = arith.constant 0 : index
      %20 = memref.load %arg4[%c0_13, %c0_14] : memref<1x1xf32, #tpu.memory_space<smem>>
      memref.store %19, %arg4[%c0_13, %c0_14] : memref<1x1xf32, #tpu.memory_space<smem>>
    } else {
    }
    return
  }
  func.func @transform_0(%arg0: i32, %arg1: i32) -> (i32, i32) {
    %c1_i32 = arith.constant 1 : i32
    %0 = arith.muli %arg0, %c1_i32 : i32
    %1 = arith.addi %0, %arg1 : i32
    %c0_i32 = arith.constant 0 : i32
    %2 = arith.minsi %1, %c0_i32 : i32
    %c0_i32_0 = arith.constant 0 : i32
    %c0_i32_1 = arith.constant 0 : i32
    return %2, %c0_i32_0 : i32, i32
  }
  func.func @transform_1(%arg0: i32, %arg1: i32) -> (i32, i32) {
    %c1_i32 = arith.constant 1 : i32
    %0 = arith.muli %arg0, %c1_i32 : i32
    %1 = arith.addi %0, %arg1 : i32
    %c0_i32 = arith.constant 0 : i32
    %2 = arith.minsi %1, %c0_i32 : i32
    %c0_i32_0 = arith.constant 0 : i32
    %c0_i32_1 = arith.constant 0 : i32
    return %2, %c0_i32_0 : i32, i32
  }
  func.func @transform_2(%arg0: i32, %arg1: i32) -> (i32, i32) {
    %c0_i32 = arith.constant 0 : i32
    %c0_i32_0 = arith.constant 0 : i32
    return %arg0, %c0_i32 : i32, i32
  }
}

</mosaic_0001>

<bundles_post_ra>
// kernel: tpu_custom_call.1
= control target key start
LH: loop header
LB: loop body
LE: loop exit
PB: predicated region body
PF: predicated region fallthrough
CT: control target
= control target key end

     0   :  { %7 = vsyncpa [#allocation4], 0  ;;  %s241_s0 = inlined_call_operand.hbm [shape: f32[16,128], index: 0, kind: input, shape index: {}]   ;;  %s242_s1 = inlined_call_operand.hbm [shape: f32[16,128], index: 1, kind: input, shape index: {}]   ;;  %s243_s2 = inlined_call_operand.hbm [shape: f32[1,1], index: 2, kind: output, shape index: {}]  }
   0x1   :  { %8 = vsyncpa [#allocation7], 0 }
   0x2   :  { %9 = vsyncpa [#allocation5], 0  ;;  %s185_s9 = smov [#allocation3]   ;;  %s125_s13 = scalar_lea.hbm %s241_s0, 256 }
   0x3   :  { %s21_s10 = sshll.u32 %s185_s9, 4  ;;  %p126_p0 = scmp.ne.s32.totalorder %s241_s0, %s125_s13  ;;  %s22_s10 = int_to_ptr.vmem [resolvable:$true] %s21_s10 }
   0x4   :  { %p129_p1 = scmp.lt.u32.totalorder %s125_s13, %s241_s0 }
   0x6   :  { %p131_p2 = pnand %p129_p1, %p126_p0 }
   0x8   :  { %134 = shalt.err (!%p131_p2)
}
   0x9   :  { %s135_s18 = scalar_lea.vmem %s22_s10, 256  ;;  %p140_p4 = scmp.lt.s32.totalorder %s22_s10, %s22_s10 }
   0xa   :  { %p136_p3 = scmp.ne.s32.totalorder %s22_s10, %s135_s18  ;;  %p141_p5 = scmp.lt.s32.totalorder %s135_s18, %s135_s18 }
   0xc   :  { %p142_p6 = por %p141_p5, %p140_p4 }
   0xe   :  { %p143_p7 = pnand %p142_p6, %p136_p3 }
  0x10   :  { %146 = shalt.err (!%p143_p7)
}
  0x11   :  { %s186_s19 = smov 128   ;;  %s187_s20 = smov 8  }
  0x12   :  { %27 = dma.hbm_to_vmem [thread:$0]  %s241_s0, 256, %s22_s10, [#allocation4], %s186_s19, %s186_s19, %s187_s20  }
  0x13   :  { %s188_s23 = smov [#allocation6]   ;;  %s147_s27 = scalar_lea.hbm %s242_s1, 256 }
  0x14   :  { %s39_s24 = sshll.u32 %s188_s23, 4  ;;  %p148_p8 = scmp.ne.s32.totalorder %s242_s1, %s147_s27  ;;  %s40_s24 = int_to_ptr.vmem [resolvable:$true] %s39_s24 }
  0x15   :  { %p151_p9 = scmp.lt.u32.totalorder %s147_s27, %s242_s1 }
  0x17   :  { %p153_p10 = pnand %p151_p9, %p148_p8 }
  0x19   :  { %156 = shalt.err (!%p153_p10)
}
  0x1a   :  { %s157_s4 = scalar_lea.vmem %s40_s24, 256  ;;  %p162_p12 = scmp.lt.s32.totalorder %s40_s24, %s40_s24 }
  0x1b   :  { %p158_p11 = scmp.ne.s32.totalorder %s40_s24, %s157_s4  ;;  %p163_p13 = scmp.lt.s32.totalorder %s157_s4, %s157_s4 }
  0x1d   :  { %p164_p0 = por %p163_p13, %p162_p12 }
  0x1f   :  { %p165_p1 = pnand %p164_p0, %p158_p11 }
  0x21   :  { %168 = shalt.err (!%p165_p1)
}
  0x22   :  { %45 = dma.hbm_to_vmem [thread:$0]  %s242_s1, 256, %s40_s24, [#allocation7], %s186_s19, %s186_s19, %s187_s20  }
  0x23   :  { %179 = dma.done.wait [#allocation4], 256  }
  0x24   :  { %180 = vsyncadd [#allocation4], 4294967040 }
  0x25   :  { %181 = dma.done.wait [#allocation7], 256  }
  0x26   :  { %182 = vsyncadd [#allocation7], 4294967040  ;;  %v66_v0 = vld [vmem:[#allocation3] sm:$0xff]  ;;  %v67_v1 = vld [vmem:[#allocation3 + $0x8] sm:$0xff]  ;;  %s169_s8 = scalar_lea.hbm %s243_s2, 16 }
  0x27   :  { %v68_v2 = vld [vmem:[#allocation6] sm:$0xff]  ;;  %v69_v3 = vld [vmem:[#allocation6 + $0x8] sm:$0xff]  ;;  %p170_p2 = scmp.ne.s32.totalorder %s243_s2, %s169_s8  ;;  %p173_p3 = scmp.lt.u32.totalorder %s169_s8, %s243_s2 }
  0x28   :  { %v70_v4 = vsub.f32 %v66_v0, %v68_v2  ;;  %v71_v5 = vsub.f32 %v67_v1, %v69_v3 }
  0x29   :  { %p175_p4 = pnand %p173_p3, %p170_p2 }
  0x2a   :  { %v72_v6 = vmul.f32 %v70_v4, %v70_v4  ;;  %v73_v7 = vmul.f32 %v71_v5, %v71_v5 }
  0x2c   :  { %v87_v8 = vadd.f32 %v73_v7, %v72_v6 }
  0x2e   :  { %88 = vadd.xlane.f32.xlu0 %v87_v8 }
  0xbb   :  { %v89_v9 = vpop.xlane.xlu0 %88 }
  0xbc   :  { %v90_v10 = vrot.slane %v89_v9, 4 }
  0xbe   :  { %v91_v11 = vadd.f32 %v90_v10, %v89_v9 }
  0xc0   :  { %v92_v12 = vrot.slane %v91_v11, 2 }
  0xc2   :  { %v93_v13 = vadd.f32 %v92_v12, %v91_v11 }
  0xc4   :  { %v94_v14 = vrot.slane %v93_v13, 1 }
  0xc6   :  { %v95_v15 = vadd.f32 %v94_v14, %v93_v13 }
  0xc8   :  { %118 = vpush %v95_v15 }
  0xf9   :  { %s119_s1 = spop %118 }
  0xfa   :  { %98 = sst [smem:[#allocation8]] %s119_s1 }
  0xfb   :  { %178 = shalt.err (!%p175_p4)
}
  0xfc   :  { %s189_s13 = smov [#allocation8]  }
  0xfd   :  { %106 = dma.smem_to_hbm %s189_s13, 16, %s243_s2, [#allocation5]  }
  0xfe   :  { %183 = dma.done.wait [#allocation5], 16  }
  0xff   :  { %184 = vsyncadd [#allocation5], 4294967280 }
 0x100   :  { %110 = sfence }
 0x101   :  { %111 = vsyncpa [#allocation4], 1 }
 0x102   :  { %112 = vsyncpa [#allocation7], 1 }
 0x103   :  { %113 = vsyncpa [#allocation5], 1 }

</bundles_post_ra>
